<compile_context>
chip_gen: v7x
topology: tpu7x:2x2x1
jax: 0.10.0
libtpu: 0.0.40
codegen_flags: <defaults>
</compile_context>

<pallas_src>
import functools

import jax
import jax.numpy as jnp
from jax import lax
from jax.experimental import pallas as pl
from jax.experimental.pallas import tpu as pltpu

BN_EPS = 1e-5
_MXU_C = 16   # contract over channels on the MXU once C_in >= this


# --------------------------------------------------------------------------
# In-kernel helpers
# --------------------------------------------------------------------------
def _conv1d_valid(x, w, use_mxu, K):
    """'valid' 1-D conv on a haloed window.

    x: (Bt, C_in, W_in) f32.
    w: (C_out, K*C_in) when use_mxu else (K, C_out, C_in).
    Returns (Bt, C_out, W_out) f32 with W_out = W_in - K + 1.
    """
    bt, c_in, w_in = x.shape
    w_out = w_in - (K - 1)
    if use_mxu:
        # Fused K-tap contraction: stack the shifted slices along channels and
        # do a single MXU dot per batch row (Bt == 1 in this regime).
        stack = jnp.concatenate([x[:, :, k:k + w_out] for k in range(K)], axis=1)
        outs = [jnp.dot(w, stack[b], preferred_element_type=jnp.float32)
                for b in range(bt)]
        return jnp.stack(outs, axis=0)
    # Small C: K*C_in rank-1 VPU FMAs; several batch rows are packed into the
    # same block so the sublanes stay busy.
    c_out = w.shape[1]
    acc = jnp.zeros((bt, c_out, w_out), jnp.float32)
    for k in range(K):                        # static unroll over taps
        xs = x[:, :, k:k + w_out]
        wk = w[k]                             # (C_out, C_in)
        for ci in range(c_in):
            acc = acc + wk[None, :, ci:ci + 1] * xs[:, ci:ci + 1, :]
    return acc


# ---- pass 1: conv1 -> haloed y1 tiles + partial BN1 stats -----------------
def _conv1_stats_kernel(x_ref, w_ref, y_ref, sum_ref, ssq_ref,
                        *, K, pad, tl, use_mxu):
    x = x_ref[...].astype(jnp.float32)                    # (Bt, C, TL + 4*pad)
    y = _conv1d_valid(x, w_ref[...].astype(jnp.float32), use_mxu, K)
    y_ref[...] = y.astype(y_ref.dtype)                    # (Bt, C, TL + 2*pad)
    y_own = y[:, :, pad:pad + tl]                         # owned columns only
    sum_ref[...] = jnp.sum(y_own, axis=(0, 2)).reshape(sum_ref.shape)
    ssq_ref[...] = jnp.sum(y_own * y_own, axis=(0, 2)).reshape(ssq_ref.shape)


# ---- pass 2: fused BN1 affine + ReLU + conv2 + partial BN2 stats ----------
def _bn_relu_conv2_stats_kernel(y1_ref, sc_ref, sh_ref, w_ref,
                                y2_ref, sum_ref, ssq_ref,
                                *, K, pad, tl, L, use_mxu):
    lb = pl.program_id(1)
    y1 = y1_ref[...].astype(jnp.float32)                  # (Bt, C, TL + 2*pad)
    h = jnp.maximum(y1 * sc_ref[...][None] + sh_ref[...][None], 0.0)
    # Halo columns outside [0, L) are conv2's zero padding, not real activations.
    g = lb * tl - pad + lax.broadcasted_iota(jnp.int32, h.shape, 2)
    h = jnp.where((g >= 0) & (g < L), h, 0.0)
    y2 = _conv1d_valid(h, w_ref[...].astype(jnp.float32), use_mxu, K)  # (Bt, C, TL)
    y2_ref[...] = y2.astype(y2_ref.dtype)
    sum_ref[...] = jnp.sum(y2, axis=(0, 2)).reshape(sum_ref.shape)
    ssq_ref[...] = jnp.sum(y2 * y2, axis=(0, 2)).reshape(ssq_ref.shape)


# ---- pass 3: fused BN2 affine + residual add + ReLU -----------------------
def _bn_residual_relu_kernel(y2_ref, x_ref, sc_ref, sh_ref, o_ref):
    y2 = y2_ref[...].astype(jnp.float32)
    out = jnp.maximum(y2 * sc_ref[...][None] + sh_ref[...][None]
                      + x_ref[...].astype(jnp.float32), 0.0)
    o_ref[...] = out.astype(o_ref.dtype)


# --------------------------------------------------------------------------
# Host-side helpers
# --------------------------------------------------------------------------
def _bn_scale_shift(part_sum, part_ssq, gamma, beta, count):
    # Tiny O(C) global BN-stat finalisation between passes (the unavoidable
    # cross-batch sync point of training BatchNorm) -- done in plain JAX.
    s = jnp.sum(part_sum, axis=(0, 1, 2))                 # (C,)
    q = jnp.sum(part_ssq, axis=(0, 1, 2))
    mean = s / count
    var = q / count - mean * mean                         # biased batch variance
    scale = gamma.astype(jnp.float32) * lax.rsqrt(var + BN_EPS)
    shift = beta.astype(jnp.float32) - mean * scale
    return scale.reshape(-1, 1), shift.reshape(-1, 1)


def _device_budgets():
    try:
        kind = jax.devices()[0].device_kind.lower()
    except Exception:
        kind = ""
    if "v7" in kind:                    # 64 MiB physical VMEM, 2 TensorCores
        return 48 * 1024 * 1024, 512
    return 96 * 1024 * 1024, 1024       # v5e / v6e: 128 MiB physical VMEM


def _choose_l_tile(L, target):
    for cand in (target, 1024, 512, 256, 128):
        if cand <= target and cand <= L and L % cand == 0:
            return cand
    # TODO(synk): ragged L (no 128-multiple divisor) falls back to a single
    # whole-L tile; a masked / BoundedSlice tail tile would enable true tiling.
    return L


# --------------------------------------------------------------------------
# Wrapper
# --------------------------------------------------------------------------
def residual_block_1d(x, params, *, act_dtype=jnp.float32):
    """x: (N, C, L) float32 in PyTorch NCL layout.  Returns (N, C, L)."""
    w1, b1, g1, be1, w2, b2, g2, be2 = params
    # TODO(synk): conv biases b1/b2 are intentionally unused -- training-mode
    # BatchNorm subtracts the batch mean, so per-channel constants added before
    # BN cancel exactly; an eval-mode (running-stats) variant would re-add them.
    del b1, b2
    # TODO(synk): PyTorch BatchNorm's running_mean/var side-effect update is
    # training bookkeeping and is not part of the forward output; not replicated.
    N, C, L = x.shape
    K = w1.shape[-1]
    pad = K // 2

    vmem_limit, tl_target = _device_budgets()
    tl = _choose_l_tile(L, tl_target)
    n_lt = L // tl

    # Batch-row packing to fill the 8 sublanes when C is small.
    bt = max(1, min(N, 8 // max(C, 1)))
    while N % bt:
        bt -= 1
    n_b = N // bt

    use_mxu = C >= _MXU_C
    if use_mxu:
        # (C_out, C_in, K) -> (C_out, K*C_in), matching the stacked-slice order.
        w1_k = jnp.transpose(w1, (0, 2, 1)).reshape(C, K * C).astype(jnp.float32)
        w2_k = jnp.transpose(w2, (0, 2, 1)).reshape(C, K * C).astype(jnp.float32)
        w_spec = pl.BlockSpec((C, K * C), lambda nb, lb: (0, 0))
    else:
        # (C_out, C_in, K) -> (K, C_out, C_in)
        w1_k = jnp.transpose(w1, (2, 0, 1)).astype(jnp.float32)
        w2_k = jnp.transpose(w2, (2, 0, 1)).astype(jnp.float32)
        w_spec = pl.BlockSpec((K, C, C), lambda nb, lb: (0, 0, 0))

    tin1 = tl + 4 * pad    # pass-1 input window
    tout1 = tl + 2 * pad   # pass-1 output window == pass-2 input window (w/ halo)

    # Overlapping pass-1 input windows.  Only x is re-tiled on the wrapper side
    # (one cheap copy); y1 is produced directly in this haloed-tile layout.
    xp = jnp.pad(x.astype(jnp.float32), ((0, 0), (0, 0), (2 * pad, 2 * pad)))
    x_tiled = jnp.stack(
        [xp[:, :, lb * tl: lb * tl + tin1] for lb in range(n_lt)], axis=1
    ).astype(act_dtype)                                    # (N, nLT, C, TIN1)

    grid = (n_b, n_lt)
    cparams = pltpu.CompilerParams(
        dimension_semantics=("parallel", "parallel"),
        vmem_limit_bytes=vmem_limit)

    x_tile_spec = pl.BlockSpec((bt, None, C, tin1), lambda nb, lb: (nb, lb, 0, 0))
    y1_tile_spec = pl.BlockSpec((bt, None, C, tout1), lambda nb, lb: (nb, lb, 0, 0))
    row_spec = pl.BlockSpec((bt, C, tl), lambda nb, lb: (nb, 0, lb))
    stat_spec = pl.BlockSpec((None, None, 1, C), lambda nb, lb: (nb, lb, 0, 0))
    vec_spec = pl.BlockSpec((C, 1), lambda nb, lb: (0, 0))

    y1_shape = jax.ShapeDtypeStruct((N, n_lt, C, tout1), act_dtype)
    y2_shape = jax.ShapeDtypeStruct((N, C, L), act_dtype)
    stat_shape = jax.ShapeDtypeStruct((n_b, n_lt, 1, C), jnp.float32)
    out_shape = jax.ShapeDtypeStruct((N, C, L), x.dtype)

    # ---- pass 1: conv1 -> haloed y1 tiles + partial BN1 stats --------------
    y1, s1, q1 = pl.pallas_call(
        functools.partial(_conv1_stats_kernel, K=K, pad=pad, tl=tl, use_mxu=use_mxu),
        grid=grid,
        in_specs=[x_tile_spec, w_spec],
        out_specs=(y1_tile_spec, stat_spec, stat_spec),
        out_shape=(y1_shape, stat_shape, stat_shape),
        compiler_params=cparams,
    )(x_tiled, w1_k)
    scale1, shift1 = _bn_scale_shift(s1, q1, g1, be1, N * L)

    # ---- pass 2: BN1 affine + ReLU + conv2 + partial BN2 stats -------------
    y2, s2, q2 = pl.pallas_call(
        functools.partial(_bn_relu_conv2_stats_kernel, K=K, pad=pad, tl=tl, L=L,
                          use_mxu=use_mxu),
        grid=grid,
        in_specs=[y1_tile_spec, vec_spec, vec_spec, w_spec],
        out_specs=(row_spec, stat_spec, stat_spec),
        out_shape=(y2_shape, stat_shape, stat_shape),
        compiler_params=cparams,
    )(y1, scale1, shift1, w2_k)
    scale2, shift2 = _bn_scale_shift(s2, q2, g2, be2, N * L)

    # ---- pass 3: BN2 affine + residual + ReLU (elementwise, DMA-bound) -----
    alias = {0: 0} if jnp.dtype(act_dtype) == jnp.dtype(x.dtype) else {}
    out = pl.pallas_call(
        _bn_residual_relu_kernel,
        grid=grid,
        in_specs=[row_spec, row_spec, vec_spec, vec_spec],
        out_specs=row_spec,
        out_shape=out_shape,
        input_output_aliases=alias,
        compiler_params=cparams,
    )(y2, x, scale2, shift2)
    return out


# ---------------- pure-JAX reference (for correctness check) ----------------
def _ref_forward(x, params):
    w1, b1, g1, be1, w2, b2, g2, be2 = params

    def conv(inp, w, b):
        p = w.shape[-1] // 2
        y = lax.conv_general_dilated(
            inp, w, window_strides=(1,), padding=[(p, p)],
            dimension_numbers=("NCH", "OIH", "NCH"))
        return y + b[None, :, None]

    def bn(inp, g, be):
        mean = jnp.mean(inp, axis=(0, 2), keepdims=True)
        var = jnp.mean((inp - mean) ** 2, axis=(0, 2), keepdims=True)
        return (inp - mean) * lax.rsqrt(var + BN_EPS) * g[None, :, None] \
               + be[None, :, None]

    out = jax.nn.relu(bn(conv(x, w1, b1), g1, be1))
    out = bn(conv(out, w2, b2), g2, be2) + x
    return jax.nn.relu(out)


if __name__ == "__main__":
    N, C, L, K = 2, 4, 16, 3
    key = jax.random.PRNGKey(0)
    kx, kw1, kb1, kw2, kb2 = jax.random.split(key, 5)

    x = jax.random.normal(kx, (N, C, L), jnp.float32)

    # Conv1d weights (C_out, C_in, K); BatchNorm gamma=1, beta=0 (PyTorch init).
    w1 = 0.1 * jax.random.normal(kw1, (C, C, K), jnp.float32)
    b1 = 0.05 * jax.random.normal(kb1, (C,), jnp.float32)
    w2 = 0.1 * jax.random.normal(kw2, (C, C, K), jnp.float32)
    b2 = 0.05 * jax.random.normal(kb2, (C,), jnp.float32)
    g1 = jnp.ones((C,), jnp.float32)
    be1 = jnp.zeros((C,), jnp.float32)
    g2 = jnp.ones((C,), jnp.float32)
    be2 = jnp.zeros((C,), jnp.float32)
    params = (w1, b1, g1, be1, w2, b2, g2, be2)

    ref = jax.block_until_ready(_ref_forward(x, params))

    # f32 intermediates (exact path, v5e default).
    out = jax.block_until_ready(residual_block_1d(x, params))
    assert out.shape == (N, C, L)
    assert jnp.allclose(out, ref, rtol=1e-4, atol=1e-4), "f32 mismatch vs reference"

    # bf16 intermediates (HBM-traffic win on v6e/v7x); compute/stats stay f32.
    out_bf16 = jax.block_until_ready(
        residual_block_1d(x, params, act_dtype=jnp.bfloat16))
    assert jnp.allclose(out_bf16.astype(jnp.float32), ref, rtol=5e-2, atol=5e-2), \
        "bf16-intermediate mismatch vs reference"

    print("KERNEL_OK")
</pallas_src>

<mosaic_0001>
module attributes {stable_mosaic.version = 11 : i64} {
  func.func @_conv1_stats_kernel(%arg0: i32, %arg1: i32, %arg2: memref<2x1x4x20xf32, #tpu.memory_space<vmem>>, %arg3: memref<3x4x4xf32, #tpu.memory_space<vmem>>, %arg4: memref<2x1x4x18xf32, #tpu.memory_space<vmem>>, %arg5: memref<1x1x1x4xf32, #tpu.memory_space<vmem>>, %arg6: memref<1x1x1x4xf32, #tpu.memory_space<vmem>>) attributes {dimension_semantics = [#tpu.dimension_semantics<parallel>, #tpu.dimension_semantics<parallel>], iteration_bounds = array<i64: 1, 1>, scalar_prefetch = 0 : i64, scratch_operands = 0 : i64, tpu.core_type = #tpu.core_type<tc>, window_params = [{transform_indices = @transform_0, window_bounds = array<i64: 2, 1, 4, 20>}, {pipeline_mode = #tpu.pipeline_mode<synchronous>, transform_indices = @transform_1, window_bounds = array<i64: 3, 4, 4>}, {transform_indices = @transform_2, window_bounds = array<i64: 2, 1, 4, 18>}, {transform_indices = @transform_3, window_bounds = array<i64: 1, 1, 1, 4>}, {transform_indices = @transform_4, window_bounds = array<i64: 1, 1, 1, 4>}]} {
    %c0 = arith.constant 0 : index
    %c0_0 = arith.constant 0 : index
    %c0_1 = arith.constant 0 : index
    %c0_2 = arith.constant 0 : index
    %0 = vector.load %arg2[%c0, %c0_0, %c0_1, %c0_2] : memref<2x1x4x20xf32, #tpu.memory_space<vmem>>, vector<2x1x4x20xf32>
    %1 = vector.shape_cast %0 : vector<2x1x4x20xf32> to vector<2x4x20xf32>
    %c0_3 = arith.constant 0 : index
    %c0_4 = arith.constant 0 : index
    %c0_5 = arith.constant 0 : index
    %2 = vector.load %arg3[%c0_3, %c0_4, %c0_5] : memref<3x4x4xf32, #tpu.memory_space<vmem>>, vector<3x4x4xf32>
    %cst = arith.constant 0.000000e+00 : f32
    %3 = vector.broadcast %cst : f32 to vector<2x4x18xf32>
    %4 = vector.extract_strided_slice %1 {offsets = [0, 0, 0], sizes = [2, 4, 18], strides = [1, 1, 1]} : vector<2x4x20xf32> to vector<2x4x18xf32>
    %5 = vector.extract_strided_slice %2 {offsets = [0, 0, 0], sizes = [1, 4, 4], strides = [1, 1, 1]} : vector<3x4x4xf32> to vector<1x4x4xf32>
    %6 = vector.shape_cast %5 : vector<1x4x4xf32> to vector<4x4xf32>
    %7 = vector.extract_strided_slice %6 {offsets = [0, 0], sizes = [4, 1], strides = [1, 1]} : vector<4x4xf32> to vector<4x1xf32>
    %8 = vector.shape_cast %7 : vector<4x1xf32> to vector<1x4x1xf32>
    %9 = vector.extract_strided_slice %4 {offsets = [0, 0, 0], sizes = [2, 1, 18], strides = [1, 1, 1]} : vector<2x4x18xf32> to vector<2x1x18xf32>
    %10 = vector.broadcast %8 : vector<1x4x1xf32> to vector<2x4x18xf32>
    %11 = vector.broadcast %9 : vector<2x1x18xf32> to vector<2x4x18xf32>
    %12 = arith.mulf %10, %11 : vector<2x4x18xf32>
    %13 = arith.addf %3, %12 : vector<2x4x18xf32>
    %14 = vector.extract_strided_slice %6 {offsets = [0, 1], sizes = [4, 1], strides = [1, 1]} : vector<4x4xf32> to vector<4x1xf32>
    %15 = vector.shape_cast %14 : vector<4x1xf32> to vector<1x4x1xf32>
    %16 = vector.extract_strided_slice %4 {offsets = [0, 1, 0], sizes = [2, 1, 18], strides = [1, 1, 1]} : vector<2x4x18xf32> to vector<2x1x18xf32>
    %17 = vector.broadcast %15 : vector<1x4x1xf32> to vector<2x4x18xf32>
    %18 = vector.broadcast %16 : vector<2x1x18xf32> to vector<2x4x18xf32>
    %19 = arith.mulf %17, %18 : vector<2x4x18xf32>
    %20 = arith.addf %13, %19 : vector<2x4x18xf32>
    %21 = vector.extract_strided_slice %6 {offsets = [0, 2], sizes = [4, 1], strides = [1, 1]} : vector<4x4xf32> to vector<4x1xf32>
    %22 = vector.shape_cast %21 : vector<4x1xf32> to vector<1x4x1xf32>
    %23 = vector.extract_strided_slice %4 {offsets = [0, 2, 0], sizes = [2, 1, 18], strides = [1, 1, 1]} : vector<2x4x18xf32> to vector<2x1x18xf32>
    %24 = vector.broadcast %22 : vector<1x4x1xf32> to vector<2x4x18xf32>
    %25 = vector.broadcast %23 : vector<2x1x18xf32> to vector<2x4x18xf32>
    %26 = arith.mulf %24, %25 : vector<2x4x18xf32>
    %27 = arith.addf %20, %26 : vector<2x4x18xf32>
    %28 = vector.extract_strided_slice %6 {offsets = [0, 3], sizes = [4, 1], strides = [1, 1]} : vector<4x4xf32> to vector<4x1xf32>
    %29 = vector.shape_cast %28 : vector<4x1xf32> to vector<1x4x1xf32>
    %30 = vector.extract_strided_slice %4 {offsets = [0, 3, 0], sizes = [2, 1, 18], strides = [1, 1, 1]} : vector<2x4x18xf32> to vector<2x1x18xf32>
    %31 = vector.broadcast %29 : vector<1x4x1xf32> to vector<2x4x18xf32>
    %32 = vector.broadcast %30 : vector<2x1x18xf32> to vector<2x4x18xf32>
    %33 = arith.mulf %31, %32 : vector<2x4x18xf32>
    %34 = arith.addf %27, %33 : vector<2x4x18xf32>
    %35 = vector.extract_strided_slice %1 {offsets = [0, 0, 1], sizes = [2, 4, 18], strides = [1, 1, 1]} : vector<2x4x20xf32> to vector<2x4x18xf32>
    %36 = vector.extract_strided_slice %2 {offsets = [1, 0, 0], sizes = [1, 4, 4], strides = [1, 1, 1]} : vector<3x4x4xf32> to vector<1x4x4xf32>
    %37 = vector.shape_cast %36 : vector<1x4x4xf32> to vector<4x4xf32>
    %38 = vector.extract_strided_slice %37 {offsets = [0, 0], sizes = [4, 1], strides = [1, 1]} : vector<4x4xf32> to vector<4x1xf32>
    %39 = vector.shape_cast %38 : vector<4x1xf32> to vector<1x4x1xf32>
    %40 = vector.extract_strided_slice %35 {offsets = [0, 0, 0], sizes = [2, 1, 18], strides = [1, 1, 1]} : vector<2x4x18xf32> to vector<2x1x18xf32>
    %41 = vector.broadcast %39 : vector<1x4x1xf32> to vector<2x4x18xf32>
    %42 = vector.broadcast %40 : vector<2x1x18xf32> to vector<2x4x18xf32>
    %43 = arith.mulf %41, %42 : vector<2x4x18xf32>
    %44 = arith.addf %34, %43 : vector<2x4x18xf32>
    %45 = vector.extract_strided_slice %37 {offsets = [0, 1], sizes = [4, 1], strides = [1, 1]} : vector<4x4xf32> to vector<4x1xf32>
    %46 = vector.shape_cast %45 : vector<4x1xf32> to vector<1x4x1xf32>
    %47 = vector.extract_strided_slice %35 {offsets = [0, 1, 0], sizes = [2, 1, 18], strides = [1, 1, 1]} : vector<2x4x18xf32> to vector<2x1x18xf32>
    %48 = vector.broadcast %46 : vector<1x4x1xf32> to vector<2x4x18xf32>
    %49 = vector.broadcast %47 : vector<2x1x18xf32> to vector<2x4x18xf32>
    %50 = arith.mulf %48, %49 : vector<2x4x18xf32>
    %51 = arith.addf %44, %50 : vector<2x4x18xf32>
    %52 = vector.extract_strided_slice %37 {offsets = [0, 2], sizes = [4, 1], strides = [1, 1]} : vector<4x4xf32> to vector<4x1xf32>
    %53 = vector.shape_cast %52 : vector<4x1xf32> to vector<1x4x1xf32>
    %54 = vector.extract_strided_slice %35 {offsets = [0, 2, 0], sizes = [2, 1, 18], strides = [1, 1, 1]} : vector<2x4x18xf32> to vector<2x1x18xf32>
    %55 = vector.broadcast %53 : vector<1x4x1xf32> to vector<2x4x18xf32>
    %56 = vector.broadcast %54 : vector<2x1x18xf32> to vector<2x4x18xf32>
    %57 = arith.mulf %55, %56 : vector<2x4x18xf32>
    %58 = arith.addf %51, %57 : vector<2x4x18xf32>
    %59 = vector.extract_strided_slice %37 {offsets = [0, 3], sizes = [4, 1], strides = [1, 1]} : vector<4x4xf32> to vector<4x1xf32>
    %60 = vector.shape_cast %59 : vector<4x1xf32> to vector<1x4x1xf32>
    %61 = vector.extract_strided_slice %35 {offsets = [0, 3, 0], sizes = [2, 1, 18], strides = [1, 1, 1]} : vector<2x4x18xf32> to vector<2x1x18xf32>
    %62 = vector.broadcast %60 : vector<1x4x1xf32> to vector<2x4x18xf32>
    %63 = vector.broadcast %61 : vector<2x1x18xf32> to vector<2x4x18xf32>
    %64 = arith.mulf %62, %63 : vector<2x4x18xf32>
    %65 = arith.addf %58, %64 : vector<2x4x18xf32>
    %66 = vector.extract_strided_slice %1 {offsets = [0, 0, 2], sizes = [2, 4, 18], strides = [1, 1, 1]} : vector<2x4x20xf32> to vector<2x4x18xf32>
    %67 = vector.extract_strided_slice %2 {offsets = [2, 0, 0], sizes = [1, 4, 4], strides = [1, 1, 1]} : vector<3x4x4xf32> to vector<1x4x4xf32>
    %68 = vector.shape_cast %67 : vector<1x4x4xf32> to vector<4x4xf32>
    %69 = vector.extract_strided_slice %68 {offsets = [0, 0], sizes = [4, 1], strides = [1, 1]} : vector<4x4xf32> to vector<4x1xf32>
    %70 = vector.shape_cast %69 : vector<4x1xf32> to vector<1x4x1xf32>
    %71 = vector.extract_strided_slice %66 {offsets = [0, 0, 0], sizes = [2, 1, 18], strides = [1, 1, 1]} : vector<2x4x18xf32> to vector<2x1x18xf32>
    %72 = vector.broadcast %70 : vector<1x4x1xf32> to vector<2x4x18xf32>
    %73 = vector.broadcast %71 : vector<2x1x18xf32> to vector<2x4x18xf32>
    %74 = arith.mulf %72, %73 : vector<2x4x18xf32>
    %75 = arith.addf %65, %74 : vector<2x4x18xf32>
    %76 = vector.extract_strided_slice %68 {offsets = [0, 1], sizes = [4, 1], strides = [1, 1]} : vector<4x4xf32> to vector<4x1xf32>
    %77 = vector.shape_cast %76 : vector<4x1xf32> to vector<1x4x1xf32>
    %78 = vector.extract_strided_slice %66 {offsets = [0, 1, 0], sizes = [2, 1, 18], strides = [1, 1, 1]} : vector<2x4x18xf32> to vector<2x1x18xf32>
    %79 = vector.broadcast %77 : vector<1x4x1xf32> to vector<2x4x18xf32>
    %80 = vector.broadcast %78 : vector<2x1x18xf32> to vector<2x4x18xf32>
    %81 = arith.mulf %79, %80 : vector<2x4x18xf32>
    %82 = arith.addf %75, %81 : vector<2x4x18xf32>
    %83 = vector.extract_strided_slice %68 {offsets = [0, 2], sizes = [4, 1], strides = [1, 1]} : vector<4x4xf32> to vector<4x1xf32>
    %84 = vector.shape_cast %83 : vector<4x1xf32> to vector<1x4x1xf32>
    %85 = vector.extract_strided_slice %66 {offsets = [0, 2, 0], sizes = [2, 1, 18], strides = [1, 1, 1]} : vector<2x4x18xf32> to vector<2x1x18xf32>
    %86 = vector.broadcast %84 : vector<1x4x1xf32> to vector<2x4x18xf32>
    %87 = vector.broadcast %85 : vector<2x1x18xf32> to vector<2x4x18xf32>
    %88 = arith.mulf %86, %87 : vector<2x4x18xf32>
    %89 = arith.addf %82, %88 : vector<2x4x18xf32>
    %90 = vector.extract_strided_slice %68 {offsets = [0, 3], sizes = [4, 1], strides = [1, 1]} : vector<4x4xf32> to vector<4x1xf32>
    %91 = vector.shape_cast %90 : vector<4x1xf32> to vector<1x4x1xf32>
    %92 = vector.extract_strided_slice %66 {offsets = [0, 3, 0], sizes = [2, 1, 18], strides = [1, 1, 1]} : vector<2x4x18xf32> to vector<2x1x18xf32>
    %93 = vector.broadcast %91 : vector<1x4x1xf32> to vector<2x4x18xf32>
    %94 = vector.broadcast %92 : vector<2x1x18xf32> to vector<2x4x18xf32>
    %95 = arith.mulf %93, %94 : vector<2x4x18xf32>
    %96 = arith.addf %89, %95 : vector<2x4x18xf32>
    %c0_6 = arith.constant 0 : index
    %c0_7 = arith.constant 0 : index
    %c0_8 = arith.constant 0 : index
    %c0_9 = arith.constant 0 : index
    %97 = vector.load %arg4[%c0_6, %c0_7, %c0_8, %c0_9] : memref<2x1x4x18xf32, #tpu.memory_space<vmem>>, vector<2x1x4x18xf32>
    %98 = vector.shape_cast %97 : vector<2x1x4x18xf32> to vector<2x4x18xf32>
    %99 = vector.shape_cast %96 : vector<2x4x18xf32> to vector<2x1x4x18xf32>
    tpu.vector_store %arg4[%c0_6, %c0_7, %c0_8, %c0_9], %99 {strides = array<i32>} : memref<2x1x4x18xf32, #tpu.memory_space<vmem>>, vector<2x1x4x18xf32>,
    %100 = vector.extract_strided_slice %96 {offsets = [0, 0, 1], sizes = [2, 4, 16], strides = [1, 1, 1]} : vector<2x4x18xf32> to vector<2x4x16xf32>
    %cst_10 = arith.constant dense<0.000000e+00> : vector<4xf32>
    %101 = vector.multi_reduction <add>, %100, %cst_10 [0, 2] : vector<2x4x16xf32> to vector<4xf32>
    %102 = vector.shape_cast %101 : vector<4xf32> to vector<1x4xf32>
    %c0_11 = arith.constant 0 : index
    %c0_12 = arith.constant 0 : index
    %c0_13 = arith.constant 0 : index
    %c0_14 = arith.constant 0 : index
    %103 = vector.load %arg5[%c0_11, %c0_12, %c0_13, %c0_14] : memref<1x1x1x4xf32, #tpu.memory_space<vmem>>, vector<1x1x1x4xf32>
    %104 = vector.shape_cast %103 : vector<1x1x1x4xf32> to vector<1x4xf32>
    %105 = vector.shape_cast %102 : vector<1x4xf32> to vector<1x1x1x4xf32>
    tpu.vector_store %arg5[%c0_11, %c0_12, %c0_13, %c0_14], %105 {strides = array<i32>} : memref<1x1x1x4xf32, #tpu.memory_space<vmem>>, vector<1x1x1x4xf32>,
    %106 = arith.mulf %100, %100 : vector<2x4x16xf32>
    %cst_15 = arith.constant dense<0.000000e+00> : vector<4xf32>
    %107 = vector.multi_reduction <add>, %106, %cst_15 [0, 2] : vector<2x4x16xf32> to vector<4xf32>
    %108 = vector.shape_cast %107 : vector<4xf32> to vector<1x4xf32>
    %c0_16 = arith.constant 0 : index
    %c0_17 = arith.constant 0 : index
    %c0_18 = arith.constant 0 : index
    %c0_19 = arith.constant 0 : index
    %109 = vector.load %arg6[%c0_16, %c0_17, %c0_18, %c0_19] : memref<1x1x1x4xf32, #tpu.memory_space<vmem>>, vector<1x1x1x4xf32>
    %110 = vector.shape_cast %109 : vector<1x1x1x4xf32> to vector<1x4xf32>
    %111 = vector.shape_cast %108 : vector<1x4xf32> to vector<1x1x1x4xf32>
    tpu.vector_store %arg6[%c0_16, %c0_17, %c0_18, %c0_19], %111 {strides = array<i32>} : memref<1x1x1x4xf32, #tpu.memory_space<vmem>>, vector<1x1x1x4xf32>,
    return
  }
  func.func @transform_0(%arg0: i32, %arg1: i32) -> (i32, i32, i32, i32) {
    %c0_i32 = arith.constant 0 : i32
    %c0_i32_0 = arith.constant 0 : i32
    %c0_i32_1 = arith.constant 0 : i32
    return %arg0, %arg1, %c0_i32, %c0_i32_0 : i32, i32, i32, i32
  }
  func.func @transform_1(%arg0: i32, %arg1: i32) -> (i32, i32, i32) {
    %c0_i32 = arith.constant 0 : i32
    %c0_i32_0 = arith.constant 0 : i32
    %c0_i32_1 = arith.constant 0 : i32
    %c0_i32_2 = arith.constant 0 : i32
    return %c0_i32, %c0_i32_0, %c0_i32_1 : i32, i32, i32
  }
  func.func @transform_2(%arg0: i32, %arg1: i32) -> (i32, i32, i32, i32) {
    %c0_i32 = arith.constant 0 : i32
    %c0_i32_0 = arith.constant 0 : i32
    %c0_i32_1 = arith.constant 0 : i32
    return %arg0, %arg1, %c0_i32, %c0_i32_0 : i32, i32, i32, i32
  }
  func.func @transform_3(%arg0: i32, %arg1: i32) -> (i32, i32, i32, i32) {
    %c0_i32 = arith.constant 0 : i32
    %c0_i32_0 = arith.constant 0 : i32
    %c0_i32_1 = arith.constant 0 : i32
    return %arg0, %arg1, %c0_i32, %c0_i32_0 : i32, i32, i32, i32
  }
  func.func @transform_4(%arg0: i32, %arg1: i32) -> (i32, i32, i32, i32) {
    %c0_i32 = arith.constant 0 : i32
    %c0_i32_0 = arith.constant 0 : i32
    %c0_i32_1 = arith.constant 0 : i32
    return %arg0, %arg1, %c0_i32, %c0_i32_0 : i32, i32, i32, i32
  }
}

</mosaic_0001>

<bundles_post_ra>
// kernel: tpu_custom_call.1
= control target key start
LH: loop header
LB: loop body
LE: loop exit
PB: predicated region body
PF: predicated region fallthrough
CT: control target
= control target key end

     0   :  { %10 = vsyncpa [#allocation3], 0  ;;  %s611_s0 = inlined_call_operand.hbm [shape: f32[2,1,4,20], index: 0, kind: input, shape index: {}]   ;;  %s612_s1 = inlined_call_operand.hbm [shape: f32[3,4,4], index: 1, kind: input, shape index: {}]   ;;  %s613_s2 = inlined_call_operand.hbm [shape: f32[2,1,4,18], index: 2, kind: output, shape index: {0}]   ;;  %s614_s3 = inlined_call_operand.hbm [shape: f32[1,1,1,4], index: 3, kind: output, shape index: {1}]   ;;  %s615_s4 = inlined_call_operand.hbm [shape: f32[1,1,1,4], index: 4, kind: output, shape index: {2}]  }
   0x1   :  { %11 = vsyncpa [#allocation6], 0 }
   0x2   :  { %12 = vsyncpa [#allocation4], 0 }
   0x3   :  { %13 = vsyncpa [#allocation9], 0  ;;  %s481_s15 = smov [#allocation2]   ;;  %s363_s19 = scalar_lea.hbm %s611_s0, 128 }
   0x4   :  { %s19_s16 = sshll.u32 %s481_s15, 4  ;;  %p364_p0 = scmp.ne.s32.totalorder %s611_s0, %s363_s19  ;;  %s20_s16 = int_to_ptr.vmem [resolvable:$true] %s19_s16 }
   0x5   :  { %p367_p1 = scmp.lt.u32.totalorder %s363_s19, %s611_s0 }
   0x7   :  { %p369_p2 = pnand %p367_p1, %p364_p0 }
   0x9   :  { %372 = shalt.err (!%p369_p2)
}
   0xa   :  { %s373_s24 = scalar_lea.vmem %s20_s16, 128  ;;  %p378_p4 = scmp.lt.s32.totalorder %s20_s16, %s20_s16 }
   0xb   :  { %p374_p3 = scmp.ne.s32.totalorder %s20_s16, %s373_s24  ;;  %p379_p5 = scmp.lt.s32.totalorder %s373_s24, %s373_s24 }
   0xd   :  { %p380_p6 = por %p379_p5, %p378_p4 }
   0xf   :  { %p381_p7 = pnand %p380_p6, %p374_p3 }
  0x11   :  { %384 = shalt.err (!%p381_p7)
}
  0x12   :  { %s482_s25 = smov 64   ;;  %s483_s26 = smov 4  }
  0x13   :  { %25 = dma.hbm_to_vmem [thread:$0]  %s611_s0, 128, %s20_s16, [#allocation3], %s482_s25, %s482_s25, %s483_s26  }
  0x14   :  { %s484_s29 = smov [#allocation5]   ;;  %s385_s7 = scalar_lea.hbm %s612_s1, 192 }
  0x15   :  { %s31_s30 = sshll.u32 %s484_s29, 4  ;;  %p386_p8 = scmp.ne.s32.totalorder %s612_s1, %s385_s7  ;;  %s32_s30 = int_to_ptr.vmem [resolvable:$true] %s31_s30 }
  0x16   :  { %p389_p9 = scmp.lt.u32.totalorder %s385_s7, %s612_s1 }
  0x18   :  { %p391_p10 = pnand %p389_p9, %p386_p8 }
  0x1a   :  { %394 = shalt.err (!%p391_p10)
}
  0x1b   :  { %s395_s12 = scalar_lea.vmem %s32_s30, 192  ;;  %p400_p12 = scmp.lt.s32.totalorder %s32_s30, %s32_s30 }
  0x1c   :  { %p396_p11 = scmp.ne.s32.totalorder %s32_s30, %s395_s12  ;;  %p401_p13 = scmp.lt.s32.totalorder %s395_s12, %s395_s12 }
  0x1e   :  { %p402_p0 = por %p401_p13, %p400_p12 }
  0x20   :  { %p403_p1 = pnand %p402_p0, %p396_p11 }
  0x22   :  { %406 = shalt.err (!%p403_p1)
}
  0x23   :  { %37 = dma.hbm_to_vmem [thread:$0]  %s612_s1, 192, %s32_s30, [#allocation6], %s482_s25, %s482_s25, %s483_s26  }
  0x24   :  { %473 = dma.done.wait [#allocation3], 128  }
  0x25   :  { %474 = vsyncadd [#allocation3], 4294967168 }
  0x26   :  { %475 = dma.done.wait [#allocation6], 192  }
  0x27   :  { %476 = vsyncadd [#allocation6], 4294967104  ;;  %v485_v0 = vmov 0   ;;  %v486_v1 = vmov 2   ;;  %v47_v2 = vld [vmem:[#allocation5 + $0x4] sm:$0xf]  ;;  %v54_v7 = vlaneseq }
  0x28   :  { %351 = vset.pattern.permute.xlu0 %v485_v0  ;;  %353 = vset.pattern.permute.xlu1 %v486_v1  ;;  %v487_v3 = vmov 1   ;;  %v488_v4 = vmov 3   ;;  %v48_v5 = vld [vmem:[#allocation5 + $0x8] sm:$0xf]  ;;  %v46_v6 = vld [vmem:[#allocation5] sm:$0xf] }
  0x29   :  { %116 = vperm.xlu0 %351, %v47_v2   ;;  %148 = vperm.xlu1 %353, %v47_v2   ;;  %v550_v8 = vshrl.u32 %v54_v7, 7  ;;  %v44_v10 = vld [vmem:[#allocation2] sm:$0xf]  ;;  %v45_v11 = vld [vmem:[#allocation2 + $0x4] sm:$0xf]  ;;  %s489_s1 = smov 127  }
  0x2a   :  { %s490_s14 = smov 126   ;;  %vm244_vm0 = vcmask 142336   ;;  %vm255_vm1 = vcmask 125952   ;;  %s491_s15 = smov [#allocation7]  }
  0x2b   :  { %v56_v9 = vsub.s32 0, %v550_v8  ;;  %v72_v14 = vsub.s32 1, %v550_v8  ;;  %v88_v21 = vsub.s32 2, %v550_v8  ;;  %v104_v22 = vsub.s32 3, %v550_v8  ;;  %s298_s16 = sshll.u32 %s491_s15, 4  ;;  %s299_s16 = int_to_ptr.vmem [resolvable:$true] %s298_s16 }
  0x2c   :  { %s407_s17 = scalar_lea.vmem %s299_s16, 128  ;;  %p412_p3 = scmp.lt.s32.totalorder %s299_s16, %s299_s16 }
  0x2d   :  { %352 = vset.pattern.permute.xlu0 %v487_v3  ;;  %354 = vset.pattern.permute.xlu1 %v488_v4  ;;  %v57_v12 = vrot.slane %v44_v10, %v56_v9  ;;  %v61_v13 = vrot.slane %v45_v11, %v56_v9  ;;  %v73_v19 = vrot.slane %v44_v10, %v72_v14  ;;  %p408_p2 = scmp.ne.s32.totalorder %s299_s16, %s407_s17  ;;  %p413_p4 = scmp.lt.s32.totalorder %s407_s17, %s407_s17 }
  0x2e   :  { %132 = vperm.xlu0 %352, %v47_v2   ;;  %164 = vperm.xlu1 %354, %v47_v2   ;;  %v77_v20 = vrot.slane %v45_v11, %v72_v14  ;;  %v89_v26 = vrot.slane %v44_v10, %v88_v21  ;;  %v93_v27 = vrot.slane %v45_v11, %v88_v21 }
  0x2f   :  { %v105_v29 = vrot.slane %v44_v10, %v104_v22  ;;  %v109_v30 = vrot.slane %v45_v11, %v104_v22  ;;  %p414_p5 = por %p413_p4, %p412_p3 }
  0x31   :  { %p415_p6 = pnand %p414_p5, %p408_p2 }
  0x32   :  { %197 = vperm.xlu0 %352, %v48_v5   ;;  %355 = vset.pattern.permute.xlu1 %v485_v0 }
  0x33   :  { %181 = vperm.xlu1 %355, %v48_v5  }
  0x36   :  { %357 = vset.pattern.permute.xlu0 %v488_v4 }
  0x37   :  { %356 = vset.pattern.permute.xlu1 %v486_v1  ;;  %229 = vperm.xlu0 %357, %v48_v5  }
  0x38   :  { %213 = vperm.xlu1 %356, %v48_v5  }
  0x3b   :  { %360 = vset.pattern.permute.xlu0 %v486_v1 }
  0x3c   :  { %358 = vset.pattern.permute.xlu1 %v485_v0  ;;  %83 = vperm.xlu0 %360, %v46_v6  }
  0x3d   :  { %51 = vperm.xlu1 %358, %v46_v6  }
  0x40   :  { %362 = vset.pattern.permute.xlu0 %v488_v4 }
  0x41   :  { %359 = vset.pattern.permute.xlu1 %v487_v3 }
  0x42   :  { %67 = vperm.xlu1 %359, %v46_v6  }
  0x46   :  { %361 = vset.pattern.permute.xlu1 %v488_v4 }
  0x47   :  { %99 = vperm.xlu1 %361, %v46_v6  }
  0xa8   :  { %v117_v15 = vpop.permute.xlu0 %116  ;;  %v149_v16 = vpop.permute.xlu1 %148 }
  0xa9   :  { %v119_v17 = vmul.f32 %v117_v15, %v57_v12  ;;  %v120_v18 = vmul.f32 %v117_v15, %v61_v13  ;;  %v151_v31 = vmul.f32 %v149_v16, %v89_v26  ;;  %v152_v32 = vmul.f32 %v149_v16, %v93_v27 }
  0xab   :  { %125 = vrot.lane.b32.xlu0 %v120_v18, %s489_s1  ;;  %123 = vrot.lane.b32.xlu1 %v119_v17, %s489_s1 }
  0xad   :  { %v133_v23 = vpop.permute.xlu0 %132  ;;  %v165_v28 = vpop.permute.xlu1 %164 }
  0xae   :  { %v135_v24 = vmul.f32 %v133_v23, %v73_v19  ;;  %v136_v25 = vmul.f32 %v133_v23, %v77_v20  ;;  %v167_v33 = vmul.f32 %v165_v28, %v105_v29  ;;  %v168_v34 = vmul.f32 %v165_v28, %v109_v30 }
  0xb0   :  { %141 = vrot.lane.b32.xlu0 %v136_v25, %s489_s1  ;;  %139 = vrot.lane.b32.xlu1 %v135_v24, %s489_s1 }
  0xb1   :  { %v198_v36 = vpop.permute.xlu0 %197 }
  0xb2   :  { %v182_v35 = vpop.permute.xlu1 %181  ;;  %v200_v42 = vmul.f32 %v198_v36, %v73_v19  ;;  %v201_v43 = vmul.f32 %v198_v36, %v77_v20 }
  0xb3   :  { %v184_v37 = vmul.f32 %v182_v35, %v57_v12  ;;  %v185_v38 = vmul.f32 %v182_v35, %v61_v13 }
  0xb4   :  { %157 = vrot.lane.b32.xlu0 %v152_v32, %s489_s1  ;;  %155 = vrot.lane.b32.xlu1 %v151_v31, %s489_s1 }
  0xb6   :  { %v230_v40 = vpop.permute.xlu0 %229 }
  0xb7   :  { %v214_v39 = vpop.permute.xlu1 %213  ;;  %v232_v54 = vmul.f32 %v230_v40, %v105_v29  ;;  %v233_v55 = vmul.f32 %v230_v40, %v109_v30 }
  0xb8   :  { %173 = vrot.lane.b32.xlu0 %v168_v34, %s489_s1  ;;  %171 = vrot.lane.b32.xlu1 %v167_v33, %s489_s1  ;;  %v216_v44 = vmul.f32 %v214_v39, %v89_v26  ;;  %v217_v46 = vmul.f32 %v214_v39, %v93_v27 }
  0xbb   :  { %v84_v45 = vpop.permute.xlu0 %83 }
  0xbc   :  { %190 = vrot.lane.b32.xlu0 %v185_v38, %s490_s14  ;;  %188 = vrot.lane.b32.xlu1 %v184_v37, %s490_s14  ;;  %v52_v41 = vpop.permute.xlu1 %51  ;;  %v94_v52 = vmul.f32 %v89_v26, %v84_v45  ;;  %v95_v53 = vmul.f32 %v93_v27, %v84_v45 }
  0xbd   :  { %v62_v47 = vmul.f32 %v57_v12, %v52_v41  ;;  %v63_v48 = vmul.f32 %v61_v13, %v52_v41 }
  0xc0   :  { %206 = vrot.lane.b32.xlu0 %v201_v43, %s490_s14  ;;  %204 = vrot.lane.b32.xlu1 %v200_v42, %s490_s14 }
  0xc1   :  { %v68_v49 = vpop.permute.xlu1 %67 }
  0xc2   :  { %v78_v50 = vmul.f32 %v73_v19, %v68_v49  ;;  %v79_v51 = vmul.f32 %v77_v20, %v68_v49 }
  0xc4   :  { %222 = vrot.lane.b32.xlu0 %v217_v46, %s490_s14  ;;  %220 = vrot.lane.b32.xlu1 %v216_v44, %s490_s14  ;;  %v80_v56 = vadd.f32 %v78_v50, %v62_v47  ;;  %v81_v57 = vadd.f32 %v79_v51, %v63_v48 }
  0xc6   :  { %v96_v58 = vadd.f32 %v94_v52, %v80_v56  ;;  %v97_v59 = vadd.f32 %v95_v53, %v81_v57  ;;  %v100_v60 = vpop.permute.xlu1 %99 }
  0xc7   :  { %v110_v61 = vmul.f32 %v105_v29, %v100_v60  ;;  %v111_v62 = vmul.f32 %v109_v30, %v100_v60 }
  0xc8   :  { %238 = vrot.lane.b32.xlu0 %v233_v55, %s490_s14  ;;  %236 = vrot.lane.b32.xlu1 %v232_v54, %s490_s14 }
  0xc9   :  { %v113_v63 = vadd.f32 %v111_v62, %v97_v59  ;;  %v112_v0 = vadd.f32 %v110_v61, %v96_v58 }
 0x11d   :  { %v126_v1 = vpop.permute.xlu0 %125  ;;  %v124_v2 = vpop.permute.xlu1 %123 }
 0x11e   :  { %v130_v11 = vadd.f32 %v126_v1, %v113_v63  ;;  %v129_v12 = vadd.f32 %v124_v2, %v112_v0 }
 0x122   :  { %v142_v3 = vpop.permute.xlu0 %141  ;;  %v140_v4 = vpop.permute.xlu1 %139 }
 0x123   :  { %v146_v15 = vadd.f32 %v142_v3, %v130_v11  ;;  %v145_v16 = vadd.f32 %v140_v4, %v129_v12 }
 0x126   :  { %v158_v5 = vpop.permute.xlu0 %157  ;;  %v156_v6 = vpop.permute.xlu1 %155 }
 0x127   :  { %v162_v17 = vadd.f32 %v158_v5, %v146_v15  ;;  %v161_v18 = vadd.f32 %v156_v6, %v145_v16 }
 0x12a   :  { %v174_v9 = vpop.permute.xlu0 %173  ;;  %v172_v10 = vpop.permute.xlu1 %171 }
 0x12b   :  { %v178_v21 = vadd.f32 %v174_v9, %v162_v17  ;;  %v177_v22 = vadd.f32 %v172_v10, %v161_v18 }
 0x12e   :  { %v191_v13 = vpop.permute.xlu0 %190  ;;  %v189_v14 = vpop.permute.xlu1 %188 }
 0x12f   :  { %v195_v23 = vadd.f32 %v191_v13, %v178_v21  ;;  %v194_v24 = vadd.f32 %v189_v14, %v177_v22 }
 0x132   :  { %v207_v19 = vpop.permute.xlu0 %206  ;;  %v205_v20 = vpop.permute.xlu1 %204 }
 0x133   :  { %v211_v27 = vadd.f32 %v207_v19, %v195_v23  ;;  %v210_v28 = vadd.f32 %v205_v20, %v194_v24 }
 0x136   :  { %v223_v25 = vpop.permute.xlu0 %222  ;;  %v221_v26 = vpop.permute.xlu1 %220 }
 0x137   :  { %v227_v29 = vadd.f32 %v223_v25, %v211_v27  ;;  %v226_v30 = vadd.f32 %v221_v26, %v210_v28 }
 0x13a   :  { %v239_v31 = vpop.permute.xlu0 %238  ;;  %v237_v32 = vpop.permute.xlu1 %236 }
 0x13b   :  { %v243_v33 = vadd.f32 %v239_v31, %v227_v29  ;;  %v242_v34 = vadd.f32 %v237_v32, %v226_v30 }
 0x13d   :  { %251 = vrot.lane.b32.xlu0 %v243_v33, %s489_s1  ;;  %249 = vrot.lane.b32.xlu1 %v242_v34, %s489_s1  ;;  %245 = vst.msk [vmem:[#allocation7] sm:$0xf] %vm244_vm0, %v242_v34  ;;  %246 = vst.msk [vmem:[#allocation7 + $0x4] sm:$0xf] %vm244_vm0, %v243_v33  ;;  %v272_v35 = vmul.f32 %v243_v33, %v243_v33  ;;  %v271_v36 = vmul.f32 %v242_v34, %v242_v34 }
 0x141   :  { %277 = vrot.lane.b32.xlu0 %v272_v35, %s489_s1  ;;  %275 = vrot.lane.b32.xlu1 %v271_v36, %s489_s1 }
 0x1af   :  { %v252_v37 = vpop.permute.xlu0 %251  ;;  %v250_v38 = vpop.permute.xlu1 %249 }
 0x1b0   :  { %v257_v39 = vsel %vm255_vm1, %v252_v37, 0.0  ;;  %v256_v40 = vsel %vm255_vm1, %v250_v38, 0.0 }
 0x1b1   :  { %v258_v41 = vadd.f32 %v257_v39, %v256_v40 }
 0x1b3   :  { %v278_v42 = vpop.permute.xlu0 %277  ;;  %259 = vadd.xlane.f32.xlu1 %v258_v41  ;;  %v276_v43 = vpop.permute.xlu1 %275 }
 0x1b4   :  { %v282_v44 = vsel %vm255_vm1, %v278_v42, 0.0  ;;  %v281_v45 = vsel %vm255_vm1, %v276_v43, 0.0 }
 0x1b5   :  { %v283_v46 = vadd.f32 %v282_v44, %v281_v45 }
 0x1b7   :  { %284 = vadd.xlane.f32.xlu0 %v283_v46 }
 0x1b8   :  { %418 = shalt.err (!%p415_p6)
}
 0x1b9   :  { %s419_s20 = scalar_lea.hbm %s613_s2, 128 }
 0x1ba   :  { %p420_p7 = scmp.ne.s32.totalorder %s613_s2, %s419_s20  ;;  %p423_p8 = scmp.lt.u32.totalorder %s419_s20, %s613_s2 }
 0x1bc   :  { %p425_p9 = pnand %p423_p8, %p420_p7 }
 0x1be   :  { %428 = shalt.err (!%p425_p9)
}
 0x1bf   :  { %304 = dma.vmem_to_hbm [thread:$0]  %s299_s16, 128, %s613_s2, [#allocation4], %s482_s25, %s482_s25, %s483_s26   ;;  %v263_v47 = vand.u32 127, %v54_v7  ;;  %vm269_vm2 = vcmask 24576  }
 0x1c0   :  { %s492_s29 = smov [#allocation8]   ;;  %s493_s5 = smov [#allocation10]  }
 0x1c1   :  { %v266_v48 = vsub.s32 %v263_v47, %v550_v8  ;;  %s311_s30 = sshll.u32 %s492_s29, 4  ;;  %s321_s6 = sshll.u32 %s493_s5, 4  ;;  %s312_s30 = int_to_ptr.vmem [resolvable:$true] %s311_s30  ;;  %s322_s6 = int_to_ptr.vmem [resolvable:$true] %s321_s6 }
 0x1c2   :  { %s429_s7 = scalar_lea.vmem %s312_s30, 16  ;;  %s433_s8 = scalar_lea.vmem %s312_s30, 32 }
 0x1c3   :  { %p430_p10 = scmp.ne.s32.totalorder %s312_s30, %s429_s7  ;;  %p434_p11 = scmp.lt.s32.totalorder %s312_s30, %s312_s30 }
 0x1c4   :  { %p435_p12 = scmp.lt.s32.totalorder %s433_s8, %s429_s7 }
 0x1c6   :  { %p436_p13 = por %p435_p12, %p434_p11 }
 0x1c8   :  { %p437_p0 = pnand %p436_p13, %p430_p10 }
 0x240   :  { %v260_v49 = vpop.xlane.xlu1 %259 }
 0x241   :  { %v267_v50 = vrot.slane %v260_v49, %v266_v48 }
 0x243   :  { %270 = vst.msk [vmem:[#allocation8] sm:$0x1] %vm269_vm2, %v267_v50 }
 0x244   :  { %v285_v51 = vpop.xlane.xlu0 %284 }
 0x245   :  { %440 = shalt.err (!%p437_p0)
}
 0x246   :  { %s441_s26 = scalar_lea.hbm %s614_s3, 16 }
 0x247   :  { %p442_p1 = scmp.ne.s32.totalorder %s614_s3, %s441_s26  ;;  %p445_p2 = scmp.lt.u32.totalorder %s441_s26, %s614_s3 }
 0x249   :  { %p447_p3 = pnand %p445_p2, %p442_p1 }
 0x24b   :  { %450 = shalt.err (!%p447_p3)
}
 0x24c   :  { %314 = dma.vmem_to_hbm [thread:$0]  %s312_s30, 16, %s614_s3, [#allocation9]   ;;  %v290_v7 = vrot.slane %v285_v51, %v266_v48 }
 0x24d   :  { %s451_s1 = scalar_lea.vmem %s322_s6, 16  ;;  %s455_s14 = scalar_lea.vmem %s322_s6, 32 }
 0x24e   :  { %292 = vst.msk [vmem:[#allocation10] sm:$0x1] %vm269_vm2, %v290_v7  ;;  %p452_p4 = scmp.ne.s32.totalorder %s322_s6, %s451_s1  ;;  %p456_p5 = scmp.lt.s32.totalorder %s322_s6, %s322_s6 }
 0x24f   :  { %p457_p6 = scmp.lt.s32.totalorder %s455_s14, %s451_s1 }
 0x251   :  { %p458_p7 = por %p457_p6, %p456_p5 }
 0x253   :  { %p459_p8 = pnand %p458_p7, %p452_p4 }
 0x255   :  { %462 = shalt.err (!%p459_p8)
}
 0x256   :  { %s463_s17 = scalar_lea.hbm %s615_s4, 16 }
 0x257   :  { %p464_p9 = scmp.ne.s32.totalorder %s615_s4, %s463_s17  ;;  %p467_p10 = scmp.lt.u32.totalorder %s463_s17, %s615_s4 }
 0x259   :  { %p469_p11 = pnand %p467_p10, %p464_p9 }
 0x25b   :  { %472 = shalt.err (!%p469_p11)
}
 0x25c   :  { %324 = dma.vmem_to_hbm [thread:$0]  %s322_s6, 16, %s615_s4, [#allocation9]  }
 0x25d   :  { %477 = dma.done.wait [#allocation4], 128  }
 0x25e   :  { %478 = vsyncadd [#allocation4], 4294967168 }
 0x25f   :  { %479 = dma.done.wait [#allocation9], 32  }
 0x260   :  { %480 = vsyncadd [#allocation9], 4294967264 }
 0x261   :  { %334 = vsyncpa [#allocation3], 1 }
 0x262   :  { %335 = vsyncpa [#allocation6], 1 }
 0x263   :  { %336 = vsyncpa [#allocation4], 1 }
 0x264   :  { %337 = vsyncpa [#allocation9], 1 }

</bundles_post_ra>
